<compile_context>
chip_gen: v5e
topology: v5e:2x2
jax: 0.10.0
libtpu: 0.0.40
codegen_flags: <defaults>
</compile_context>

<pallas_src>
import functools
import math

import jax
import jax.numpy as jnp
from jax import lax
from jax.experimental import pallas as pl
from jax.experimental.pallas import tpu as pltpu


# ------------------------------------------------------------------------------- kernel


def _flash_attention_kernel(q_ref, k_ref, v_ref, mask_ref, o_ref,
                            m_scr, l_scr, acc_scr,
                            *, scale, bb, d, pack_out, pv_dtype):
    """One (batch-block, query-tile, kv-tile) step of masked softmax attention.

    Block shapes:
      q_ref    : (BB, TQ, D)      k_ref/v_ref : (BB, TK, D)
      mask_ref : (BB, TQ, TK)     o_ref       : (1, TQ, BB*D) if pack_out else (BB, TQ, D)
      scratch  : m_scr/l_scr (BB, TQ, 1) f32, acc_scr (BB, TQ, D) f32
    """
    ki = pl.program_id(2)

    @pl.when(ki == 0)
    def _init():
        m_scr[...] = jnp.full(m_scr.shape, -jnp.inf, dtype=m_scr.dtype)
        l_scr[...] = jnp.zeros(l_scr.shape, dtype=l_scr.dtype)
        acc_scr[...] = jnp.zeros(acc_scr.shape, dtype=acc_scr.dtype)

    # Keep both MXU operands in the input dtype (bf16 inputs stay bf16); fold the
    # 1/sqrt(hidden_dim) scale into the small (BB, TQ, D) q tile instead of the scores.
    q = q_ref[...]
    q = q * jnp.asarray(scale, dtype=q.dtype)

    # scores = q @ k^T (+ mask); K is consumed un-transposed (contraction over D,
    # batch over BB) so no XLU transpose is generated.
    s = lax.dot_general(q, k_ref[...],
                        dimension_numbers=(((2,), (2,)), ((0,), (0,))),
                        preferred_element_type=jnp.float32)
    s = s + mask_ref[...].astype(jnp.float32)                      # (BB, TQ, TK)

    # Online (flash-style) softmax update with deferred normalization.
    m_prev = m_scr[...]
    m_new = jnp.maximum(m_prev, jnp.max(s, axis=-1, keepdims=True))
    alpha = jnp.exp(m_prev - m_new)                                # rescale of old state
    p = jnp.exp(s - m_new)                                         # (BB, TQ, TK)
    l_scr[...] = alpha * l_scr[...] + jnp.sum(p, axis=-1, keepdims=True)
    pv = lax.dot_general(p.astype(pv_dtype), v_ref[...].astype(pv_dtype),
                         dimension_numbers=(((2,), (1,)), ((0,), (0,))),
                         preferred_element_type=jnp.float32)
    acc_scr[...] = alpha * acc_scr[...] + pv
    m_scr[...] = m_new

    @pl.when(ki == pl.num_programs(2) - 1)
    def _finalize():
        inv_l = pl.reciprocal(l_scr[...], approx=False)            # exact EUP reciprocal
        out = acc_scr[...] * inv_l                                 # (BB, TQ, D) f32
        if pack_out:
            # Lane-dense store: batch b's (TQ, D) tile goes to lanes [b*D, (b+1)*D) of a
            # (TQ, BB*D) output block -> contiguous HBM writeback even for D < 128.
            for b in range(bb):                                    # static, BB is small
                o_ref[0, :, b * d:(b + 1) * d] = out[b].astype(o_ref.dtype)
        else:
            o_ref[...] = out.astype(o_ref.dtype)


# -------------------------------------------------------------------- block selection


def _vmem_capacity_bytes():
    """Per-core VMEM capacity; conservative 64 MiB (v7x) fallback."""
    try:
        cap = getattr(pltpu.get_tpu_info(), "vmem_capacity_bytes", None)
        if cap:
            return int(cap)
    except Exception:
        pass
    return 64 << 20


def _tile_candidates(S, min_tile):
    cands = {S}
    for c in (2048, 1024, 512, 256, 128, 64, 32, 16, 8):
        if min_tile <= c < S and S % c == 0:
            cands.add(c)
    return sorted(cands, reverse=True)


def _working_set_bytes(bb, tq, tk, d, q_item, mask_item, out_item):
    """Everything resident in VMEM for one grid step: double-buffered pipeline blocks,
    single-buffered (lane-padded) scratch, and the f32 score/probability temporaries."""
    d_pad = -(-d // 128) * 128                 # lane padding of the feature dim
    ws = 2 * bb * tq * tk * mask_item          # mask block
    ws += 2 * bb * tq * d_pad * q_item         # q block
    ws += 2 * 2 * bb * tk * d_pad * q_item     # k + v blocks
    ws += 2 * bb * tq * d_pad * out_item       # out block
    ws += 2 * bb * tq * 128 * 4                # m / l scratch (lane-padded f32)
    ws += bb * tq * d_pad * 4                  # accumulator scratch (f32)
    ws += 2 * bb * tq * tk * 4                 # in-kernel f32 scores + probabilities
    return ws


def _choose_blocks(B, S, D, q_item, mask_item, out_item, budget,
                   block_b=None, block_q=None, block_k=None):
    """Pick (BB, TQ, TK) maximizing per-step volume under the VMEM budget."""
    tq_cands = [block_q] if block_q is not None else _tile_candidates(S, min_tile=8)
    tk_cands = [block_k] if block_k is not None else _tile_candidates(S, min_tile=128)
    if block_b is not None:
        bb_cands = [block_b]
    else:
        bb_max = max(1, B // 2)                # keep >= 2 batch grid steps (v7x megacore)
        bb_cands = [b for b in range(min(bb_max, 8), 0, -1) if B % b == 0]

    best_key, best = None, None
    for bb in bb_cands:
        for tq in tq_cands:
            for tk in tk_cands:
                ws = _working_set_bytes(bb, tq, tk, D, q_item, mask_item, out_item)
                if ws > budget:
                    continue
                key = (bb * tq * tk, tq, bb, tk)   # per-step volume, then bigger q-tile
                if best_key is None or key > best_key:
                    best_key, best = key, (bb, tq, tk, ws)
    if best is None:                           # nothing fits: fall back to smallest blocks
        bb, tq, tk = min(bb_cands), min(tq_cands), min(tk_cands)
        best = (bb, tq, tk,
                _working_set_bytes(bb, tq, tk, D, q_item, mask_item, out_item))
    return best


# ------------------------------------------------------------------------------ wrapper


def self_attention2(q, k, v, mask, *, hidden_dim,
                    mask_dtype=jnp.bfloat16, pv_dtype=None,
                    block_b=None, block_q=None, block_k=None):
    """softmax(q @ k^T / sqrt(hidden_dim) + mask) @ v, matching SelfAttention2.forward.

    mask_dtype: dtype the additive mask is streamed in (default bf16: exact for 0/-1e9
      masks, halves the dominant HBM stream; pass None to keep arbitrary-valued masks).
    pv_dtype: optional operand dtype for the P@V matmul (e.g. bf16 for f32 inputs);
      default keeps V's dtype. Accumulation is always f32.
    """
    B, S, D = q.shape
    assert k.shape == (B, S, D) and v.shape == (B, S, D)
    assert mask.shape == (B, S, S)
    assert k.dtype == q.dtype and v.dtype == q.dtype

    if mask_dtype is not None and mask.dtype != jnp.dtype(mask_dtype):
        mask = mask.astype(mask_dtype)
    out_dtype = q.dtype
    if pv_dtype is None:
        pv_dtype = v.dtype

    q_item = jnp.dtype(q.dtype).itemsize
    mask_item = jnp.dtype(mask.dtype).itemsize
    out_item = jnp.dtype(out_dtype).itemsize

    cap = _vmem_capacity_bytes()
    BB, TQ, TK, ws = _choose_blocks(B, S, D, q_item, mask_item, out_item,
                                    budget=cap // 2,
                                    block_b=block_b, block_q=block_q, block_k=block_k)
    assert B % BB == 0 and S % TQ == 0 and S % TK == 0

    pack_out = (D < 128) and (BB > 1)          # lane-dense store path for narrow features
    grid = (B // BB, S // TQ, S // TK)
    scale = 1.0 / math.sqrt(float(hidden_dim))

    kernel = functools.partial(_flash_attention_kernel, scale=scale, bb=BB, d=D,
                               pack_out=pack_out, pv_dtype=pv_dtype)

    in_specs = [
        pl.BlockSpec((BB, TQ, D), lambda b, qi, ki: (b, qi, 0)),    # q (revisited over ki)
        pl.BlockSpec((BB, TK, D), lambda b, qi, ki: (b, ki, 0)),    # k
        pl.BlockSpec((BB, TK, D), lambda b, qi, ki: (b, ki, 0)),    # v
        pl.BlockSpec((BB, TQ, TK), lambda b, qi, ki: (b, qi, ki)),  # mask
    ]
    if pack_out:
        out_shape = jax.ShapeDtypeStruct((B // BB, S, BB * D), out_dtype)
        out_spec = pl.BlockSpec((1, TQ, BB * D), lambda b, qi, ki: (b, qi, 0))
    else:
        out_shape = jax.ShapeDtypeStruct((B, S, D), out_dtype)
        out_spec = pl.BlockSpec((BB, TQ, D), lambda b, qi, ki: (b, qi, 0))

    cost = pl.CostEstimate(
        flops=4 * B * S * S * D,                        # QK^T and PV matmuls
        transcendentals=B * S * S,                      # exp in the softmax
        bytes_accessed=4 * B * S * D * q_item + B * S * S * mask_item,
    )
    vmem_limit = int(min(max(ws + (4 << 20), 32 << 20),
                         max(cap - (8 << 20), cap // 2)))

    out = pl.pallas_call(
        kernel,
        out_shape=out_shape,
        grid_spec=pltpu.PrefetchScalarGridSpec(
            num_scalar_prefetch=0,
            grid=grid,
            in_specs=in_specs,
            out_specs=out_spec,
            scratch_shapes=[
                pltpu.VMEM((BB, TQ, 1), jnp.float32),   # running max
                pltpu.VMEM((BB, TQ, 1), jnp.float32),   # running sum
                pltpu.VMEM((BB, TQ, D), jnp.float32),   # output accumulator
            ],
        ),
        compiler_params=pltpu.CompilerParams(
            dimension_semantics=("parallel", "parallel", "arbitrary"),
            vmem_limit_bytes=vmem_limit,
        ),
        cost_estimate=cost,
    )(q, k, v, mask)

    if pack_out:                                        # (B//BB, S, BB*D) -> (B, S, D)
        out = out.reshape(B // BB, S, BB, D)
        out = jnp.swapaxes(out, 1, 2).reshape(B, S, D)
    return out


# --------------------------------------------------------------------------------- test


def _reference(q, k, v, mask, hidden_dim):
    scores = jnp.einsum("bqd,bkd->bqk", q, k) / jnp.sqrt(jnp.float32(hidden_dim))
    weights = jax.nn.softmax(scores + mask, axis=-1)
    return jnp.einsum("bqk,bkd->bqd", weights, v)


def _make_inputs(key, B, S, D):
    kq, kk, kv, km = jax.random.split(key, 4)
    q = jax.random.normal(kq, (B, S, D), jnp.float32)
    k = jax.random.normal(kk, (B, S, D), jnp.float32)
    v = jax.random.normal(kv, (B, S, D), jnp.float32)
    mask = jnp.where(jax.random.uniform(km, (B, S, S)) > 0.5, 0.0, -1e9).astype(jnp.float32)
    return q, k, v, mask


if __name__ == "__main__":
    key = jax.random.PRNGKey(0)
    k0, k1, k2 = jax.random.split(key, 3)

    # Note: the reference module's nn.Linear q/k/v projections are never applied in
    # forward(); the kernel therefore consumes x1/x2/x3 directly as q/k/v.

    # 1) Small shape consistent with the module (batch=2, seq=8, hidden_dim=32).
    B, S, D = 2, 8, 32
    q, k, v, mask = _make_inputs(k0, B, S, D)
    out = jax.block_until_ready(self_attention2(q, k, v, mask, hidden_dim=D))
    ref = _reference(q, k, v, mask, D)
    assert jnp.allclose(out, ref, atol=5e-5, rtol=5e-5), "mismatch (basic path)"

    # 2) Batch-blocked, lane-dense packed-output path (BB=4, D=32 -> 128-lane stores).
    B, S, D = 8, 128, 32
    q, k, v, mask = _make_inputs(k1, B, S, D)
    out = jax.block_until_ready(self_attention2(q, k, v, mask, hidden_dim=D))
    ref = _reference(q, k, v, mask, D)
    assert jnp.allclose(out, ref, atol=5e-5, rtol=5e-5), "mismatch (packed-output path)"

    # 3) Flash path with multiple KV steps (forced 128-wide KV tiles over S=256).
    B, S, D = 2, 256, 32
    q, k, v, mask = _make_inputs(k2, B, S, D)
    out = jax.block_until_ready(
        self_attention2(q, k, v, mask, hidden_dim=D, block_q=128, block_k=128))
    ref = _reference(q, k, v, mask, D)
    assert jnp.allclose(out, ref, atol=5e-5, rtol=5e-5), "mismatch (multi KV-step path)"

    print("KERNEL_OK")
</pallas_src>

<mosaic_0001>
module attributes {stable_mosaic.version = 11 : i64} {
  func.func @_flash_attention_kernel(%arg0: i32, %arg1: i32, %arg2: i32, %arg3: memref<1x8x32xf32, #tpu.memory_space<vmem>>, %arg4: memref<1x8x32xf32, #tpu.memory_space<vmem>>, %arg5: memref<1x8x32xf32, #tpu.memory_space<vmem>>, %arg6: memref<1x8x8xbf16, #tpu.memory_space<vmem>>, %arg7: memref<1x8x32xf32, #tpu.memory_space<vmem>>, %arg8: memref<1x8x1xf32, #tpu.memory_space<vmem>>, %arg9: memref<1x8x1xf32, #tpu.memory_space<vmem>>, %arg10: memref<1x8x32xf32, #tpu.memory_space<vmem>>) attributes {dimension_semantics = [#tpu.dimension_semantics<parallel>, #tpu.dimension_semantics<parallel>, #tpu.dimension_semantics<arbitrary>], iteration_bounds = array<i64: 2, 1, 1>, scalar_prefetch = 0 : i64, scratch_operands = 3 : i64, tpu.core_type = #tpu.core_type<tc>, window_params = [{transform_indices = @transform_0, window_bounds = array<i64: 1, 8, 32>}, {transform_indices = @transform_1, window_bounds = array<i64: 1, 8, 32>}, {transform_indices = @transform_2, window_bounds = array<i64: 1, 8, 32>}, {transform_indices = @transform_3, window_bounds = array<i64: 1, 8, 8>}, {transform_indices = @transform_4, window_bounds = array<i64: 1, 8, 32>}]} {
    %c0_i32 = arith.constant 0 : i32
    %0 = arith.cmpi eq, %arg2, %c0_i32 : i32
    %1 = arith.extui %0 : i1 to i32
    %c0_i32_0 = arith.constant 0 : i32
    %2 = arith.cmpi ne, %1, %c0_i32_0 : i32
    scf.if %2 {
      %cst_36 = arith.constant 0xFF800000 : f32
      %37 = vector.broadcast %cst_36 : f32 to vector<1x8x1xf32>
      %c0_37 = arith.constant 0 : index
      %c0_38 = arith.constant 0 : index
      %c0_39 = arith.constant 0 : index
      %38 = vector.load %arg8[%c0_37, %c0_38, %c0_39] : memref<1x8x1xf32, #tpu.memory_space<vmem>>, vector<1x8x1xf32>
      tpu.vector_store %arg8[%c0_37, %c0_38, %c0_39], %37 {strides = array<i32>} : memref<1x8x1xf32, #tpu.memory_space<vmem>>, vector<1x8x1xf32>,
      %cst_40 = arith.constant 0.000000e+00 : f32
      %39 = vector.broadcast %cst_40 : f32 to vector<1x8x1xf32>
      %c0_41 = arith.constant 0 : index
      %c0_42 = arith.constant 0 : index
      %c0_43 = arith.constant 0 : index
      %40 = vector.load %arg9[%c0_41, %c0_42, %c0_43] : memref<1x8x1xf32, #tpu.memory_space<vmem>>, vector<1x8x1xf32>
      tpu.vector_store %arg9[%c0_41, %c0_42, %c0_43], %39 {strides = array<i32>} : memref<1x8x1xf32, #tpu.memory_space<vmem>>, vector<1x8x1xf32>,
      %cst_44 = arith.constant 0.000000e+00 : f32
      %41 = vector.broadcast %cst_44 : f32 to vector<1x8x32xf32>
      %c0_45 = arith.constant 0 : index
      %c0_46 = arith.constant 0 : index
      %c0_47 = arith.constant 0 : index
      %42 = vector.load %arg10[%c0_45, %c0_46, %c0_47] : memref<1x8x32xf32, #tpu.memory_space<vmem>>, vector<1x8x32xf32>
      tpu.vector_store %arg10[%c0_45, %c0_46, %c0_47], %41 {strides = array<i32>} : memref<1x8x32xf32, #tpu.memory_space<vmem>>, vector<1x8x32xf32>,
    } else {
    }
    %c0 = arith.constant 0 : index
    %c0_1 = arith.constant 0 : index
    %c0_2 = arith.constant 0 : index
    %3 = vector.load %arg3[%c0, %c0_1, %c0_2] : memref<1x8x32xf32, #tpu.memory_space<vmem>>, vector<1x8x32xf32>
    %cst = arith.constant 0.176776692 : f32
    %4 = vector.broadcast %cst : f32 to vector<1x8x32xf32>
    %5 = arith.mulf %3, %4 : vector<1x8x32xf32>
    %c0_3 = arith.constant 0 : index
    %c0_4 = arith.constant 0 : index
    %c0_5 = arith.constant 0 : index
    %6 = vector.load %arg4[%c0_3, %c0_4, %c0_5] : memref<1x8x32xf32, #tpu.memory_space<vmem>>, vector<1x8x32xf32>
    %cst_6 = arith.constant dense<0.000000e+00> : vector<1x8x8xf32>
    %7 = tpu.matmul %5, %6, %cst_6 {dimension_numbers = #tpu.dot_dimension_numbers<[2], [2], [1], [1], [0, 0, 0, 1, 1, 1], [0], [0]>} : vector<1x8x32xf32>, vector<1x8x32xf32>, vector<1x8x8xf32> -> vector<1x8x8xf32>
    %c0_7 = arith.constant 0 : index
    %c0_8 = arith.constant 0 : index
    %c0_9 = arith.constant 0 : index
    %8 = vector.load %arg6[%c0_7, %c0_8, %c0_9] : memref<1x8x8xbf16, #tpu.memory_space<vmem>>, vector<1x8x8xbf16>
    %9 = arith.extf %8 : vector<1x8x8xbf16> to vector<1x8x8xf32>
    %10 = arith.addf %7, %9 : vector<1x8x8xf32>
    %c0_10 = arith.constant 0 : index
    %c0_11 = arith.constant 0 : index
    %c0_12 = arith.constant 0 : index
    %11 = vector.load %arg8[%c0_10, %c0_11, %c0_12] : memref<1x8x1xf32, #tpu.memory_space<vmem>>, vector<1x8x1xf32>
    %cst_13 = arith.constant dense<0xFF800000> : vector<1x8xf32>
    %12 = vector.multi_reduction <maximumf>, %10, %cst_13 [2] : vector<1x8x8xf32> to vector<1x8xf32>
    %13 = vector.shape_cast %12 : vector<1x8xf32> to vector<1x8x1xf32>
    %14 = arith.maximumf %11, %13 : vector<1x8x1xf32>
    %15 = arith.subf %11, %14 : vector<1x8x1xf32>
    %16 = math.exp %15 : vector<1x8x1xf32>
    %17 = vector.broadcast %14 : vector<1x8x1xf32> to vector<1x8x8xf32>
    %18 = arith.subf %10, %17 : vector<1x8x8xf32>
    %19 = math.exp %18 : vector<1x8x8xf32>
    %c0_14 = arith.constant 0 : index
    %c0_15 = arith.constant 0 : index
    %c0_16 = arith.constant 0 : index
    %20 = vector.load %arg9[%c0_14, %c0_15, %c0_16] : memref<1x8x1xf32, #tpu.memory_space<vmem>>, vector<1x8x1xf32>
    %21 = arith.mulf %16, %20 : vector<1x8x1xf32>
    %cst_17 = arith.constant dense<0.000000e+00> : vector<1x8xf32>
    %22 = vector.multi_reduction <add>, %19, %cst_17 [2] : vector<1x8x8xf32> to vector<1x8xf32>
    %23 = vector.shape_cast %22 : vector<1x8xf32> to vector<1x8x1xf32>
    %24 = arith.addf %21, %23 : vector<1x8x1xf32>
    %c0_18 = arith.constant 0 : index
    %c0_19 = arith.constant 0 : index
    %c0_20 = arith.constant 0 : index
    %25 = vector.load %arg9[%c0_18, %c0_19, %c0_20] : memref<1x8x1xf32, #tpu.memory_space<vmem>>, vector<1x8x1xf32>
    tpu.vector_store %arg9[%c0_18, %c0_19, %c0_20], %24 {strides = array<i32>} : memref<1x8x1xf32, #tpu.memory_space<vmem>>, vector<1x8x1xf32>,
    %c0_21 = arith.constant 0 : index
    %c0_22 = arith.constant 0 : index
    %c0_23 = arith.constant 0 : index
    %26 = vector.load %arg5[%c0_21, %c0_22, %c0_23] : memref<1x8x32xf32, #tpu.memory_space<vmem>>, vector<1x8x32xf32>
    %cst_24 = arith.constant dense<0.000000e+00> : vector<1x8x32xf32>
    %27 = tpu.matmul %19, %26, %cst_24 {dimension_numbers = #tpu.dot_dimension_numbers<[2], [1], [1], [2], [0, 0, 0, 1, 1, 2], [0], [0]>} : vector<1x8x8xf32>, vector<1x8x32xf32>, vector<1x8x32xf32> -> vector<1x8x32xf32>
    %c0_25 = arith.constant 0 : index
    %c0_26 = arith.constant 0 : index
    %c0_27 = arith.constant 0 : index
    %28 = vector.load %arg10[%c0_25, %c0_26, %c0_27] : memref<1x8x32xf32, #tpu.memory_space<vmem>>, vector<1x8x32xf32>
    %29 = vector.broadcast %16 : vector<1x8x1xf32> to vector<1x8x32xf32>
    %30 = arith.mulf %29, %28 : vector<1x8x32xf32>
    %31 = arith.addf %30, %27 : vector<1x8x32xf32>
    %c0_28 = arith.constant 0 : index
    %c0_29 = arith.constant 0 : index
    %c0_30 = arith.constant 0 : index
    %32 = vector.load %arg10[%c0_28, %c0_29, %c0_30] : memref<1x8x32xf32, #tpu.memory_space<vmem>>, vector<1x8x32xf32>
    tpu.vector_store %arg10[%c0_28, %c0_29, %c0_30], %31 {strides = array<i32>} : memref<1x8x32xf32, #tpu.memory_space<vmem>>, vector<1x8x32xf32>,
    %c0_31 = arith.constant 0 : index
    %c0_32 = arith.constant 0 : index
    %c0_33 = arith.constant 0 : index
    %33 = vector.load %arg8[%c0_31, %c0_32, %c0_33] : memref<1x8x1xf32, #tpu.memory_space<vmem>>, vector<1x8x1xf32>
    tpu.vector_store %arg8[%c0_31, %c0_32, %c0_33], %14 {strides = array<i32>} : memref<1x8x1xf32, #tpu.memory_space<vmem>>, vector<1x8x1xf32>,
    %c0_i32_34 = arith.constant 0 : i32
    %34 = arith.cmpi eq, %arg2, %c0_i32_34 : i32
    %35 = arith.extui %34 : i1 to i32
    %c0_i32_35 = arith.constant 0 : i32
    %36 = arith.cmpi ne, %35, %c0_i32_35 : i32
    scf.if %36 {
      %c0_36 = arith.constant 0 : index
      %c0_37 = arith.constant 0 : index
      %c0_38 = arith.constant 0 : index
      %37 = vector.load %arg9[%c0_36, %c0_37, %c0_38] : memref<1x8x1xf32, #tpu.memory_space<vmem>>, vector<1x8x1xf32>
      %38 = tpu.reciprocal %37 : vector<1x8x1xf32> -> vector<1x8x1xf32>
      %c0_39 = arith.constant 0 : index
      %c0_40 = arith.constant 0 : index
      %c0_41 = arith.constant 0 : index
      %39 = vector.load %arg10[%c0_39, %c0_40, %c0_41] : memref<1x8x32xf32, #tpu.memory_space<vmem>>, vector<1x8x32xf32>
      %40 = vector.broadcast %38 : vector<1x8x1xf32> to vector<1x8x32xf32>
      %41 = arith.mulf %39, %40 : vector<1x8x32xf32>
      %c0_42 = arith.constant 0 : index
      %c0_43 = arith.constant 0 : index
      %c0_44 = arith.constant 0 : index
      %42 = vector.load %arg7[%c0_42, %c0_43, %c0_44] : memref<1x8x32xf32, #tpu.memory_space<vmem>>, vector<1x8x32xf32>
      tpu.vector_store %arg7[%c0_42, %c0_43, %c0_44], %41 {strides = array<i32>} : memref<1x8x32xf32, #tpu.memory_space<vmem>>, vector<1x8x32xf32>,
    } else {
    }
    return
  }
  func.func @transform_0(%arg0: i32, %arg1: i32, %arg2: i32) -> (i32, i32, i32) {
    %c0_i32 = arith.constant 0 : i32
    %c0_i32_0 = arith.constant 0 : i32
    return %arg0, %arg1, %c0_i32 : i32, i32, i32
  }
  func.func @transform_1(%arg0: i32, %arg1: i32, %arg2: i32) -> (i32, i32, i32) {
    %c0_i32 = arith.constant 0 : i32
    %c0_i32_0 = arith.constant 0 : i32
    return %arg0, %arg2, %c0_i32 : i32, i32, i32
  }
  func.func @transform_2(%arg0: i32, %arg1: i32, %arg2: i32) -> (i32, i32, i32) {
    %c0_i32 = arith.constant 0 : i32
    %c0_i32_0 = arith.constant 0 : i32
    return %arg0, %arg2, %c0_i32 : i32, i32, i32
  }
  func.func @transform_3(%arg0: i32, %arg1: i32, %arg2: i32) -> (i32, i32, i32) {
    %c0_i32 = arith.constant 0 : i32
    return %arg0, %arg1, %arg2 : i32, i32, i32
  }
  func.func @transform_4(%arg0: i32, %arg1: i32, %arg2: i32) -> (i32, i32, i32) {
    %c0_i32 = arith.constant 0 : i32
    %c0_i32_0 = arith.constant 0 : i32
    return %arg0, %arg1, %c0_i32 : i32, i32, i32
  }
}

</mosaic_0001>

<bundles_post_ra>
// kernel: tpu_custom_call.1
= control target key start
LH: loop header
LB: loop body
LE: loop exit
PB: predicated region body
PF: predicated region fallthrough
CT: control target
= control target key end

     0   :  { %s1205_s0 = inlined_call_operand.hbm [shape: f32[2,8,32], index: 0, kind: input, shape index: {}]   ;;  %s1206_s1 = inlined_call_operand.hbm [shape: f32[2,8,32], index: 1, kind: input, shape index: {}]   ;;  %s1207_s2 = inlined_call_operand.hbm [shape: f32[2,8,32], index: 2, kind: input, shape index: {}]   ;;  %s1208_s3 = inlined_call_operand.hbm [shape: bf16[2,8,8], index: 3, kind: input, shape index: {}]   ;;  %s1209_s4 = inlined_call_operand.hbm [shape: f32[2,8,32], index: 4, kind: output, shape index: {}]  }
   0x1   :  { %1214 = sst [smem:[#allocation22_spill]] %s1205_s0 }
   0x2   :  { %1215 = sst [smem:[#allocation23_spill]] %s1206_s1 }
   0x3   :  { %9 = vsyncpa [#allocation6], 0 }
   0x4   :  { %11 = vsyncpa [#allocation6 + $0x1], 0 }
   0x5   :  { %12 = vsyncpa [#allocation9], 0 }
   0x6   :  { %14 = vsyncpa [#allocation9 + $0x1], 0 }
   0x7   :  { %15 = vsyncpa [#allocation12], 0 }
   0x8   :  { %17 = vsyncpa [#allocation12 + $0x1], 0 }
   0x9   :  { %18 = vsyncpa [#allocation7], 0 }
   0xa   :  { %20 = vsyncpa [#allocation7 + $0x1], 0  ;;  %s1015_s15 = smov 0   ;;  %s1017_s16 = smov 0  }
   0xb   :  { %s1019_s17 = smov 0   ;;  %s1021_s18 = smov 0  }
   0xc   :  { %s1023_s19 = smov 0   ;;  %s1025_s20 = smov 0  }
   0xd LB: > { %1216 = sst [smem:[#allocation18_spill]] %s973_s17  ;;  %s1046_s21 = sadd.s32 4294967295, %s985_s20   ;;  %s985_s20 = sphi %s1025_s20, %s26_s20   ;;  %s981_s19 = sphi %s1023_s19, %s1235_s19   ;;  %s977_s18 = sphi %s1021_s18, %s1234_s18   ;;  %s973_s17 = sphi %s1019_s17, %s1230_s17   ;;  %s969_s16 = sphi %s1017_s16, %s1233_s16   ;;  %s965_s15 = sphi %s1015_s15, %s1232_s15  }
   0xe   : > { %1217 = sst [smem:[#allocation19_spill]] %s985_s20  ;;  %s662_s22 = sadd.s32 4294967294, %s985_s20  }
   0xf   : > { %s45_s23 = sadd.s32 1, %s981_s19  ;;  %s54_s24 = sadd.s32 1, %s973_s17 }
  0x10   : > { %p47_p0 = scmp.ge.s32.totalorder %s45_s23, 2  ;;  %p61_p1 = scmp.ne.s32.totalorder %s973_s17, %s969_s16 }
  0x11   : > { %p62_p2 = scmp.eq.s32.totalorder %s985_s20, 0  ;;  %p67_p3 = scmp.ne.s32.totalorder %s969_s16, %s965_s15 }
  0x12   : > { %s1237_s23 = smov (%p47_p0, %s45_s23), 0  ;;  %p68_p5 = scmp.eq.s32.totalorder %s1046_s21, 0 }
  0x13   : > { %1218 = sst [smem:[#allocation20_spill]] %s1237_s23  ;;  %p1058_p4 = por %p62_p2, %p61_p1 }
  0x14   : > { %s49_s26 = ssub.s32 %s981_s19, %s1237_s23  ;;  %p179_p6 = scmp.eq.s32.totalorder %s1046_s21, 1 }
  0x15   : > { %p52_p7 = scmp.eq.s32.totalorder %s49_s26, 0  ;;  %p1066_p8 = por %p68_p5, %p67_p3 }
  0x16   : > { %p1070_p9 = por %p179_p6, %p61_p1  ;;  %p185_p10 = scmp.eq.s32.totalorder %s662_s22, 1 }
  0x17   : > { %s1075_s29 = scalar_select %p52_p7, %s973_s17, %s54_s24  }
  0x18   : > { %p1077_p11 = por %p185_p10, %p67_p3  ;;  %p664_p12 = scmp.ge.s32.totalorder %s985_s20, 2 }
  0x19   : > { %1222 = sst [smem:[#allocation21_spill]] %s1075_s29  ;;  %p713_p13 = scmp.lt.s32.totalorder %s985_s20, 2 }
  0x1a   : > { %s1084_s5 = sand.u32 1, %s973_s17   ;;  %s666_s7 = sshll.u32 %s981_s19, 3 }
  0x1b   : > { %s665_s6 = sshll.u32 %s1084_s5, 3  ;;  %p1090_p0 = pnand %p713_p13, %p1058_p4 }
  0x1c   : > { %s225_s9 = sand.u32 1, %s985_s20   ;;  %s1225_s1 = sld [smem:[#allocation23_spill]] }
  0x1d   : > { %s229_s14 = scalar_lea.vmem [#allocation8], %s665_s6  ;;  %s226_s24 = scalar_lea.sflag [#allocation9], %s225_s9 }
  0x1e   : > { %s238_s22 = sshll.u32 %s229_s14, 4  ;;  %p673_p1 = scmp.ge.s32.totalorder %s985_s20, 1  ;;  %s239_s22 = int_to_ptr.vmem [resolvable:$true] %s238_s22 }
  0x1f   : > { %p284_p2 = scmp.lt.s32.totalorder %s985_s20, 3  ;;  %s1227_s0 = sld [smem:[#allocation22_spill]] }
  0x20   : > { %s209_s14 = scalar_lea.vmem [#allocation5], %s665_s6  ;;  %s206_s9 = scalar_lea.sflag [#allocation6], %s1084_s5 }
  0x21   : > { %p1102_p3 = pnand %p673_p1, %p284_p2  ;;  %s254_s23 = scalar_lea.hbm %s1207_s2, %s666_s7 }
  0x22   : > { %s234_s12 = scalar_lea.hbm %s1225_s1, %s666_s7  ;;  %s218_s1 = sshll.u32 %s209_s14, 4  ;;  %s219_s1 = int_to_ptr.vmem [resolvable:$true] %s218_s1 }
  0x23   : > { %s236_s13 = sshll.u32 %s234_s12, 4  ;;  %s256_s29 = sshll.u32 %s254_s23, 4  ;;  %s237_s13 = int_to_ptr.hbm [resolvable:$true] %s236_s13  ;;  %s257_s29 = int_to_ptr.hbm [resolvable:$true] %s256_s29 }
  0x24   : > { %702 = dma.hbm_to_vmem [thread:$0]  (!%p1090_p0), %s237_s13, 128, %s239_s22, %s226_s24  }
  0x25   : > { %s214_s11 = scalar_lea.hbm %s1227_s0, %s666_s7  ;;  %s249_s17 = scalar_lea.vmem [#allocation10], %s665_s6 }
  0x26   : > { %s216_s12 = sshll.u32 %s214_s11, 4  ;;  %s258_s26 = sshll.u32 %s249_s17, 4  ;;  %s217_s12 = int_to_ptr.hbm [resolvable:$true] %s216_s12  ;;  %s259_s26 = int_to_ptr.vmem [resolvable:$true] %s258_s26 }
  0x27   : > { %699 = dma.hbm_to_vmem [thread:$0]  (!%p1090_p0), %s217_s12, 128, %s219_s1, %s206_s9  }
  0x28   : > { %705 = dma.hbm_to_vmem [thread:$0]  (!%p1090_p0), %s257_s29, 128, %s259_s26, %s226_s24  }
  0x29   : > { %s671_s10 = sshll.u32 %s1084_s5, 2  ;;  %s672_s11 = sshll.u32 %s981_s19, 2 }
  0x2a   : > { %s275_s20 = scalar_lea.hbm %s1208_s3, %s672_s11  ;;  %s269_s1 = scalar_lea.vmem [#allocation11], %s671_s10 }
  0x2b   : > { %s279_s12 = sshll.u32 %s269_s1, 4  ;;  %s277_s9 = sshll.u32 %s275_s20, 4  ;;  %s280_s12 = int_to_ptr.vmem [resolvable:$true] %s279_s12  ;;  %s278_s9 = int_to_ptr.hbm [resolvable:$true] %s277_s9 }
  0x2c   : > { %s266_s7 = scalar_lea.sflag [#allocation12], %s1084_s5  ;;  %288 = sbr.rel (%p1102_p3) target bundleno = 673 (0x2a1), region = 36 }
  0x2d   : > { %708 = dma.hbm_to_vmem [thread:$0]  (!%p1090_p0), %s278_s9, 64, %s280_s12, %s266_s7  }
  0x2e   : > { %s1128_s17 = sand.u32 (!%p1102_p3), 1, %s969_s16  }
  0x2f   : > { %s1131_s23 = sshll.u32 (!%p1102_p3), %s1128_s17, 3  ;;  %s291_s0 = scalar_lea.sflag (!%p1102_p3), [#allocation6], %s1128_s17 }
  0x30   : > { %s294_s29 = scalar_lea.vmem (!%p1102_p3), [#allocation5], %s1131_s23 }
  0x31   : > { %948 = dma.done.wait (%p1066_p8), %s291_s0, 128  }
  0x32   : > { %950 = vsyncadd (%p1066_p8), %s291_s0, 4294967168  ;;  %s300_s20 = sand.u32 1, %s1046_s21   ;;  %s304_s6 = scalar_lea.vmem [#allocation8], %s1131_s23 }
  0x33   : > { %s301_s5 = scalar_lea.sflag [#allocation9], %s300_s20 }
  0x34   : > { %952 = dma.done.wait (%p1066_p8), %s301_s5, 256  }
  0x35   : > { %954 = vsyncadd (%p1066_p8), %s301_s5, 4294967040  ;;  %s677_s8 = sshll.u32 %s1128_s17, 2  ;;  %s314_s24 = scalar_lea.vmem [#allocation10], %s1131_s23 }
  0x36   : > { %s321_s25 = scalar_lea.sflag [#allocation12], %s1128_s17  ;;  %s324_s13 = scalar_lea.vmem [#allocation11], %s677_s8 }
  0x37   : > { %956 = dma.done.wait (%p1066_p8), %s321_s25, 64  }
  0x38   : > { %958 = vsyncadd (%p1066_p8), %s321_s25, 4294967232  ;;  %vm372_vm0 = vcmask 261120   ;;  %v987_v0 = vmov 0.0   ;;  %v376_v1 = vld [vmem:[%s304_s6] sm:$0xff]  ;;  %v374_v2 = vld [vmem:[%s294_s29] sm:$0xff]  ;;  %vm369_vm1 = vcmask 7168  }
  0x39   : > { %373 = vst.msk [vmem:[#allocation4] sm:$0xff] %vm372_vm0, %v987_v0  ;;  %679 = vmatpush.xpose.msk.msra.mxu0 %vm372_vm0, %v376_v1  ;;  %v375_v3 = vmul.f32 0.17677669, %v374_v2  ;;  %v988_v4 = vmov -inf   ;;  %v377_v5 = vld [vmem:[%s324_s13] sm:$0xf] }
  0x3a   : > { %370 = vst.msk [vmem:[#allocation2] sm:$0xff] %vm369_vm1, %v988_v4  ;;  %v378_v6 = vunpack.c.l.bf16 %v377_v5  ;;  %vm407_vm2 = vcmask 64512   ;;  %v989_v10 = vmov 0   ;;  %v431_v15 = vld [vmem:[%s314_s24] sm:$0xff]  ;;  %s683_s21 = sshll.u32 %s977_s18, 3  ;;  %s364_s10 = scalar_lea.vmem [#allocation13], %s1131_s23 }
  0x3b   : > { %371 = vst.msk [vmem:[#allocation3] sm:$0xff] %vm369_vm1, %v987_v0  ;;  %766 = vset.pattern.permute.xlu0 %v989_v10  ;;  %767 = vset.pattern.permute.xlu1 %v989_v10  ;;  %s503_s26 = scalar_lea.hbm %s1209_s4, %s683_s21  ;;  %s505_s11 = sshll.u32 %s364_s10, 4  ;;  %s506_s11 = int_to_ptr.vmem [resolvable:$true] %s505_s11 }
  0x3c   : > { %680 = vmatmul.msk.f32.vlgmr.msra.gmra.mxu0 %vm372_vm0, %v375_v3  ;;  %768 = vset.pattern.permute.xlu2 %v989_v10  ;;  %s507_s14 = sshll.u32 %s503_s26, 4  ;;  %s492_s1 = scalar_lea.sflag [#allocation7], %s1128_s17  ;;  %s508_s14 = int_to_ptr.hbm [resolvable:$true] %s507_s14 }
  0x3d   : > { %450 = vmatpush.msra.mxu1 %v431_v15  ;;  %s909_s12 = sshra.s32 %s508_s14, 4  ;;  %s915_s23 = scalar_lea.hbm %s1209_s4, 16  ;;  %s910_s12 = int_to_ptr.hbm [resolvable:$true] %s909_s12 }
  0x3e   : > { %s911_s9 = scalar_lea.hbm %s910_s12, 8  ;;  %p916_p7 = scmp.lt.s32.totalorder %s910_s12, %s1209_s4 }
  0x3f   : > { %p912_p4 = scmp.ne.s32.totalorder %s910_s12, %s911_s9  ;;  %p917_p8 = scmp.lt.s32.totalorder %s915_s23, %s911_s9 }
  0x40   : > { %v455_v32 = vld [vmem:[#allocation4] sm:$0xff] }
  0x41   : > { %v406_v11 = vld [vmem:[#allocation2] sm:$0xff]  ;;  %p913_p5 = pnand %p912_p4, %p1070_p9  ;;  %p918_p10 = por %p917_p8, %p916_p7 }
  0x42   : > { %v423_v23 = vld [vmem:[#allocation3] sm:$0xff] }
  0x43   : > { %p914_p6 = pneg %p913_p5 }
  0x45   : > { %p919_p13 = pnand %p918_p10, %p914_p6 }
  0xb9   : > { %v403_v7 = vpop.f32.mrf.mxu0 }
  0xba   : > { %v404_v8 = vadd.f32 %v403_v7, %v378_v6 }
  0xbc   : > { %v408_v9 = vsel %vm407_vm2, %v404_v8, -inf }
  0xbd   : > { %409 = vmax.xlane.f32.xlu0 %v408_v9 }
 0x130   : > { %v410_v12 = vpop.xlane.xlu0 %409 }
 0x131   : > { %v411_v13 = vmax.f32 %v406_v11, %v410_v12 }
 0x133   : > { %v412_v14 = vsub.f32 %v406_v11, %v411_v13  ;;  %464 = vst.msk [vmem:[#allocation2] sm:$0xff] %vm369_vm1, %v411_v13  ;;  %417 = vperm.xlu0 %766, %v411_v13  }
 0x135   : > { %v413_v21 = vmul.f32 1.442695, %v412_v14 }
 0x1a5   : > { %v418_v16 = vpop.permute.xlu0 %417 }
 0x1a6   : > { %v420_v17 = vsub.f32 %v404_v8, %v418_v16 }
 0x1a8   : > { %v421_v18 = vmul.f32 1.442695, %v420_v17 }
 0x1aa   : > { %769 = vpow2.f32 %v421_v18 }
 0x1ab   : > { %771 = vpow2.f32 %v413_v21 }
 0x1b0   : > { %v770_v19 = vpop.eup %769 }
 0x1b1   : > { %681 = vmatmul.msk.f32.vlgmr.msra.gmra.mxu1 %vm407_vm2, %v770_v19  ;;  %v425_v20 = vsel %vm407_vm2, %v770_v19, 0.0  ;;  %v772_v22 = vpop.eup %771 }
 0x1b2   : > { %426 = vadd.xlane.f32.xlu1 %v425_v20  ;;  %v424_v24 = vmul.f32 %v772_v22, %v423_v23 }
 0x1cb   : > { %458 = vperm.xlu1 %767, %v772_v22  }
 0x225   : > { %v427_v25 = vpop.xlane.xlu1 %426 }
 0x226   : > { %v428_v26 = vadd.f32 %v427_v25, %v424_v24 }
 0x228   : > { %430 = vst.msk [vmem:[#allocation3] sm:$0xff] %vm369_vm1, %v428_v26 }
 0x22e   : > { %v452_v39 = vpop.f32.mrf.mxu1 }
 0x22f   : > { %v468_v27 = vld [vmem:[#allocation3] sm:$0xff] }
 0x230   : > { %773 = vrcp.f32 %v468_v27  ;;  %v480_v31 = vand.u32 2147483648, %v468_v27  ;;  %v478_v34 = vand.u32 2147483647, %v468_v27  ;;  %vm474_vm4 = vweird.f32 %v468_v27 }
 0x232   : > { %v481_v38 = vor.u32 1.1754944e-38, %v480_v31  ;;  %vm479_vm6 = vcmp.eq.f32.partialorder %v478_v34, 8.507059e+37 }
 0x236   : > { %v774_v28 = vpop.eup %773 }
 0x237   : > { %v470_v29 = vmul.f32 %v774_v28, %v468_v27  ;;  %vm475_vm3 = vweird.f32 %v774_v28 }
 0x238   : > { %vm476_vm5 = vmor %vm474_vm4, %vm475_vm3 }
 0x239   : > { %v471_v30 = vsub.f32 1.0, %v470_v29 }
 0x23b   : > { %v472_v33 = vmul.f32 %v774_v28, %v471_v30 }
 0x23d   : > { %v459_v35 = vpop.permute.xlu1 %458  ;;  %v473_v36 = vadd.f32 %v774_v28, %v472_v33 }
 0x23e   : > { %v461_v37 = vmul.f32 %v459_v35, %v455_v32 }
 0x23f   : > { %v477_v40 = vsel %vm476_vm5, %v774_v28, %v473_v36 }
 0x240   : > { %v462_v41 = vadd.f32 %v461_v37, %v452_v39  ;;  %v482_v42 = vsel %vm479_vm6, %v481_v38, %v477_v40 }
 0x241   : > { %486 = vperm.xlu2 %768, %v482_v42  }
 0x242   : > { %463 = vst.msk [vmem:[#allocation4] sm:$0xff] %vm372_vm0, %v462_v41 }
 0x249   : > { %v483_v43 = vld [vmem:[#allocation4] sm:$0xff] }
 0x29b   : > { %v487_v44 = vpop.permute.xlu2 %486 }
 0x29c   : > { %v489_v45 = vmul.f32 %v487_v44, %v483_v43 }
 0x29e   : > { %490 = vst.msk [vmem:[%s364_s10] sm:$0xff] %vm372_vm0, %v489_v45 }
 0x29f   : > { %922 = shalt.err (!%p919_p13)
}
 0x2a0   : > { %694 = dma.vmem_to_hbm [thread:$0]  (%p1070_p9), %s506_s11, 128, %s508_s14, %s492_s1  }
 0x2a1 PF: > { %s1228_s17 = sld [smem:[#allocation19_spill]]  ;;  %s519_s20 = sand.u32 1, %s965_s15  }
 0x2a2   : > { %p710_p0 = pnand %p664_p12, %p1077_p11  ;;  %s520_s5 = scalar_lea.sflag [#allocation7], %s519_s20 }
 0x2a4   : > { %p711_p1 = pneg %p710_p0 }
 0x2a6   : > { %960 = dma.done.wait (%p711_p1), %s520_s5, 128  }
 0x2a7   : > { %962 = vsyncadd (%p711_p1), %s520_s5, 4294967168  ;;  %s26_s20 = sadd.s32 1, %s1228_s17   ;;  %s1229_s6 = sld [smem:[#allocation18_spill]] }
 0x2a8   : > { %p23_p2 = scmp.ge.s32.totalorder %s26_s20, 4   ;;  %s1230_s17 = sld [smem:[#allocation21_spill]] }
 0x2a9   : > { %s1231_s28 = sld [smem:[#allocation20_spill]]  ;;  %s1232_s15 = smov %s969_s16 }
 0x2aa   : > { %s1234_s18 = smov %s981_s19 }
 0x2ab   :  { %25 = sbr.rel (!%p23_p2) target bundleno = 13 (0xd), region = 126 }
 0x2ad   : > { %s1233_s16 = smov %s1229_s6 }
 0x2af   : > { %s1235_s19 = smov %s1231_s28 }
 0x2b0   :  { %526 = vsyncpa [#allocation6], 1 }
 0x2b1   :  { %528 = vsyncpa [#allocation6 + $0x1], 1 }
 0x2b2   :  { %529 = vsyncpa [#allocation9], 1 }
 0x2b3   :  { %531 = vsyncpa [#allocation9 + $0x1], 1 }
 0x2b4   :  { %532 = vsyncpa [#allocation12], 1 }
 0x2b5   :  { %534 = vsyncpa [#allocation12 + $0x1], 1 }
 0x2b6   :  { %535 = vsyncpa [#allocation7], 1 }
 0x2b7   :  { %537 = vsyncpa [#allocation7 + $0x1], 1 }

</bundles_post_ra>
